<compile_context>
chip_gen: v7x
topology: tpu7x:2x2x1
jax: 0.10.0
libtpu: 0.0.40
codegen_flags: <defaults>
</compile_context>

<pallas_src>
import functools

import jax
import jax.numpy as jnp
from jax.experimental import pallas as pl
from jax.experimental.pallas import tpu as pltpu


_LANE = 128                 # vreg lane width
_SUBLANE = 8                # f32 sublane count
_MAX_BATCH_TILE = 2048
# Conservative budget for tiles + weights; paired with an explicit
# vmem_limit_bytes it is safe on v5e (16 MiB scoped default), v6e and v7x.
_VMEM_DATA_BUDGET = 24 * 1024 * 1024
_VMEM_LIMIT_BYTES = 32 * 1024 * 1024


def _round_up(x, m):
    return -(-x // m) * m


# ----------------------------------------------------------------------------
# Kernels
# ----------------------------------------------------------------------------
def _latent_encoder_train_kernel(x_ref, wcat_ref, bcat_ref, eps_ref,
                                 z_ref, mean_ref, logvar_ref):
    """Training path: one fused MXU matmul -> [mean | logvar], then z.

    wcat_ref is (D_in, 2*Dp) with Dp a multiple of 128, so the slices below and
    the three stores are all lane-aligned.  No concatenates, no packed slab.
    """
    d = mean_ref.shape[-1]

    fused = jnp.dot(x_ref[...], wcat_ref[...],
                    preferred_element_type=jnp.float32) + bcat_ref[...]
    mean = fused[:, :d]
    logvar = fused[:, d:]

    std = jnp.exp(0.5 * logvar)                    # EUP transcendental, f32
    z_ref[...] = (mean + eps_ref[...] * std).astype(z_ref.dtype)   # VPU FMA
    mean_ref[...] = mean.astype(mean_ref.dtype)
    logvar_ref[...] = logvar.astype(logvar_ref.dtype)


def _latent_encoder_eval_kernel(x_ref, wm_ref, bm_ref, mean_ref):
    """Eval path: only the mean head (a single GEMM)."""
    mean_ref[...] = (
        jnp.dot(x_ref[...], wm_ref[...], preferred_element_type=jnp.float32)
        + bm_ref[...]
    ).astype(mean_ref.dtype)


# ----------------------------------------------------------------------------
# Tiling helper
# ----------------------------------------------------------------------------
def _pick_batch_tile(batch, d_in, d_pad):
    """Largest 8-aligned batch tile whose double-buffered tiles + pinned
    weights fit the VMEM data budget; split big batches across >=2 blocks so
    both v7x TensorCores get work."""
    # Per-row f32 bytes (x + eps + 3 outputs), double-buffered by the pipeline.
    per_row = 2 * 4 * (d_in + 4 * d_pad)
    # Weights + bias (constant index_map, but still double-buffered by default).
    weight_bytes = 2 * 4 * (d_in * 2 * d_pad + 2 * d_pad)
    avail = max(_VMEM_DATA_BUDGET - weight_bytes, per_row * _SUBLANE)
    tb = max((avail // per_row) // _SUBLANE * _SUBLANE, _SUBLANE)
    tb = min(tb, _MAX_BATCH_TILE)
    if batch <= tb:
        if batch >= 512:
            # >= 2 grid blocks so the "parallel" axis feeds both v7x TCs.
            half = _round_up(-(-batch // 2), _SUBLANE)
            tb = min(half, tb)
        else:
            tb = batch       # single block; block_shape == full array dim
    return tb


# ----------------------------------------------------------------------------
# Wrapper
# ----------------------------------------------------------------------------
@functools.partial(jax.jit, static_argnames=("training",))
def latent_encoder_forward(params, x, rng=None, *, training=True):
    """Pallas implementation of LatentEncoder.forward.

    params: dict from init_latent_encoder_params (carries the pre-fused,
            lane-padded w_cat / b_cat in addition to the raw per-head weights).
    x: (batch, input_dim) float32.
    rng: jax PRNG key for the reparameterization noise (training only).
    """
    batch, d_in = x.shape
    d_out = params["w_mean"].shape[1]

    cparams = pltpu.CompilerParams(
        dimension_semantics=("parallel",),
        vmem_limit_bytes=_VMEM_LIMIT_BYTES,
    )

    if training:
        d_pad = params["w_cat"].shape[1] // 2
        if rng is None:
            rng = jax.random.PRNGKey(0)
        # torch.randn_like equivalent, drawn at padded lane width so every
        # kernel store stays lane-dense.
        # NOTE: pltpu.prng_seed / pltpu.stateful_normal would remove this HBM
        # stream on real TPUs, but they do not lower under the CPU interpreter
        # used for validation, so the noise is streamed in instead.
        eps = jax.random.normal(rng, (batch, d_pad), jnp.float32)

        tb = _pick_batch_tile(batch, d_in, d_pad)
        grid = (pl.cdiv(batch, tb),)

        z, mean, logvar = pl.pallas_call(
            _latent_encoder_train_kernel,
            grid=grid,
            in_specs=[
                # x / eps tiles march down the batch axis.
                pl.BlockSpec((tb, d_in), lambda i: (i, 0)),
                # Weights / biases pinned across grid steps (constant map).
                pl.BlockSpec((d_in, 2 * d_pad), lambda i: (0, 0)),
                pl.BlockSpec((1, 2 * d_pad), lambda i: (0, 0)),
                pl.BlockSpec((tb, d_pad), lambda i: (i, 0)),
            ],
            out_specs=(
                pl.BlockSpec((tb, d_pad), lambda i: (i, 0)),
                pl.BlockSpec((tb, d_pad), lambda i: (i, 0)),
                pl.BlockSpec((tb, d_pad), lambda i: (i, 0)),
            ),
            out_shape=(
                jax.ShapeDtypeStruct((batch, d_pad), jnp.float32),
                jax.ShapeDtypeStruct((batch, d_pad), jnp.float32),
                jax.ShapeDtypeStruct((batch, d_pad), jnp.float32),
            ),
            compiler_params=cparams,
        )(x, params["w_cat"], params["b_cat"], eps)

        if d_pad != d_out:
            # Strip the lane padding (only when d_out is not 128-aligned).
            z = z[:, :d_out]
            mean = mean[:, :d_out]
            logvar = logvar[:, :d_out]
        return z, mean, logvar

    # Eval path: a single small GEMM.  (Plain XLA jnp.dot is equally good here;
    # kept as a Pallas kernel for a uniform code path.)
    tb = _pick_batch_tile(batch, d_in, _round_up(d_out, _LANE))
    grid = (pl.cdiv(batch, tb),)
    mean = pl.pallas_call(
        _latent_encoder_eval_kernel,
        grid=grid,
        in_specs=[
            pl.BlockSpec((tb, d_in), lambda i: (i, 0)),
            pl.BlockSpec((d_in, d_out), lambda i: (0, 0)),
            pl.BlockSpec((1, d_out), lambda i: (0, 0)),
        ],
        out_specs=pl.BlockSpec((tb, d_out), lambda i: (i, 0)),
        out_shape=jax.ShapeDtypeStruct((batch, d_out), jnp.float32),
        compiler_params=cparams,
    )(x, params["w_mean"], params["b_mean"])
    return mean


# ----------------------------------------------------------------------------
# Parameter init (mirrors nn.Linear + xavier_uniform_), plus one-time fusion
# and lane padding of the two heads.
# ----------------------------------------------------------------------------
def init_latent_encoder_params(key, input_dim, output_dim):
    k_wm, k_wl, k_bm, k_bl = jax.random.split(key, 4)
    xavier_bound = (6.0 / (input_dim + output_dim)) ** 0.5       # xavier_uniform_
    bias_bound = 1.0 / (input_dim ** 0.5)                        # Linear bias default
    w_mean = jax.random.uniform(k_wm, (input_dim, output_dim), jnp.float32,
                                -xavier_bound, xavier_bound)
    w_logvar = jax.random.uniform(k_wl, (input_dim, output_dim), jnp.float32,
                                  -xavier_bound, xavier_bound)
    b_mean = jax.random.uniform(k_bm, (1, output_dim), jnp.float32,
                                -bias_bound, bias_bound)
    b_logvar = jax.random.uniform(k_bl, (1, output_dim), jnp.float32,
                                  -bias_bound, bias_bound)

    # One-time head fusion + zero padding to a 128-lane multiple: the training
    # kernel gets a single (D_in, 2*Dp) weight slab with no per-call concat and
    # fully lane-aligned slices/stores.  Padded logvar columns are 0 -> std=1,
    # harmless and stripped in the wrapper.
    d_pad = _round_up(output_dim, _LANE)
    pad = d_pad - output_dim
    w_cat = jnp.concatenate(
        [jnp.pad(w_mean, ((0, 0), (0, pad))),
         jnp.pad(w_logvar, ((0, 0), (0, pad)))], axis=1)
    b_cat = jnp.concatenate(
        [jnp.pad(b_mean, ((0, 0), (0, pad))),
         jnp.pad(b_logvar, ((0, 0), (0, pad)))], axis=1)

    return {
        "w_mean": w_mean, "b_mean": b_mean,
        "w_logvar": w_logvar, "b_logvar": b_logvar,
        "w_cat": w_cat, "b_cat": b_cat,
    }


# ----------------------------------------------------------------------------
# Main
# ----------------------------------------------------------------------------
if __name__ == "__main__":
    key = jax.random.PRNGKey(0)
    k_params, k_x, k_eps = jax.random.split(key, 3)

    batch = 8
    input_dim = 32    # "hidden" size feeding the latent heads
    output_dim = 16   # latent dimension

    params = init_latent_encoder_params(k_params, input_dim, output_dim)
    x = jax.random.normal(k_x, (batch, input_dim), jnp.float32)

    # Training-mode forward: (z, mean, logvar), like the PyTorch module.
    z, mean, logvar = latent_encoder_forward(params, x, k_eps, training=True)
    jax.block_until_ready((z, mean, logvar))

    # Eval-mode forward: mean only.
    mean_eval = latent_encoder_forward(params, x, training=False)
    jax.block_until_ready(mean_eval)

    # Reference in plain JAX (HIGHEST precision so the reference itself is f32).
    hi = jax.lax.Precision.HIGHEST
    ref_mean = jnp.dot(x, params["w_mean"], precision=hi) + params["b_mean"]
    ref_logvar = jnp.dot(x, params["w_logvar"], precision=hi) + params["b_logvar"]
    assert jnp.allclose(mean, ref_mean, atol=2e-2, rtol=2e-2)
    assert jnp.allclose(logvar, ref_logvar, atol=2e-2, rtol=2e-2)
    assert jnp.allclose(mean_eval, ref_mean, atol=2e-2, rtol=2e-2)

    # Reparameterization check: jax.random is a pure function of (key, shape),
    # so we can regenerate the exact eps the wrapper used.
    d_pad = params["w_cat"].shape[1] // 2
    eps_used = jax.random.normal(k_eps, (batch, d_pad), jnp.float32)[:, :output_dim]
    ref_z = ref_mean + eps_used * jnp.exp(0.5 * ref_logvar)
    assert jnp.all(jnp.isfinite(z))
    assert jnp.allclose(z, ref_z, atol=2e-2, rtol=2e-2)

    print("KERNEL_OK")
</pallas_src>

<mosaic_0001>
module attributes {stable_mosaic.version = 11 : i64} {
  func.func @_latent_encoder_train_kernel(%arg0: i32, %arg1: memref<8x32xf32, #tpu.memory_space<vmem>>, %arg2: memref<32x256xf32, #tpu.memory_space<vmem>>, %arg3: memref<1x256xf32, #tpu.memory_space<vmem>>, %arg4: memref<8x128xf32, #tpu.memory_space<vmem>>, %arg5: memref<8x128xf32, #tpu.memory_space<vmem>>, %arg6: memref<8x128xf32, #tpu.memory_space<vmem>>, %arg7: memref<8x128xf32, #tpu.memory_space<vmem>>) attributes {dimension_semantics = [#tpu.dimension_semantics<parallel>], iteration_bounds = array<i64: 1>, scalar_prefetch = 0 : i64, scratch_operands = 0 : i64, tpu.core_type = #tpu.core_type<tc>, window_params = [{transform_indices = @transform_0, window_bounds = array<i64: 8, 32>}, {pipeline_mode = #tpu.pipeline_mode<synchronous>, transform_indices = @transform_1, window_bounds = array<i64: 32, 256>}, {pipeline_mode = #tpu.pipeline_mode<synchronous>, transform_indices = @transform_2, window_bounds = array<i64: 1, 256>}, {transform_indices = @transform_3, window_bounds = array<i64: 8, 128>}, {transform_indices = @transform_4, window_bounds = array<i64: 8, 128>}, {transform_indices = @transform_5, window_bounds = array<i64: 8, 128>}, {transform_indices = @transform_6, window_bounds = array<i64: 8, 128>}]} {
    %c0 = arith.constant 0 : index
    %c0_0 = arith.constant 0 : index
    %0 = vector.load %arg1[%c0, %c0_0] : memref<8x32xf32, #tpu.memory_space<vmem>>, vector<8x32xf32>
    %c0_1 = arith.constant 0 : index
    %c0_2 = arith.constant 0 : index
    %1 = vector.load %arg2[%c0_1, %c0_2] : memref<32x256xf32, #tpu.memory_space<vmem>>, vector<32x256xf32>
    %cst = arith.constant dense<0.000000e+00> : vector<8x256xf32>
    %2 = tpu.matmul %0, %1, %cst {dimension_numbers = #tpu.dot_dimension_numbers<[1], [0], [0], [1], [0, 0, 1, 1], [], []>} : vector<8x32xf32>, vector<32x256xf32>, vector<8x256xf32> -> vector<8x256xf32>
    %c0_3 = arith.constant 0 : index
    %c0_4 = arith.constant 0 : index
    %3 = vector.load %arg3[%c0_3, %c0_4] : memref<1x256xf32, #tpu.memory_space<vmem>>, vector<1x256xf32>
    %4 = vector.broadcast %3 : vector<1x256xf32> to vector<8x256xf32>
    %5 = arith.addf %2, %4 : vector<8x256xf32>
    %6 = vector.extract_strided_slice %5 {offsets = [0, 0], sizes = [8, 128], strides = [1, 1]} : vector<8x256xf32> to vector<8x128xf32>
    %7 = vector.extract_strided_slice %5 {offsets = [0, 128], sizes = [8, 128], strides = [1, 1]} : vector<8x256xf32> to vector<8x128xf32>
    %cst_5 = arith.constant 5.000000e-01 : f32
    %8 = vector.broadcast %cst_5 : f32 to vector<8x128xf32>
    %9 = arith.mulf %8, %7 : vector<8x128xf32>
    %10 = math.exp %9 : vector<8x128xf32>
    %c0_6 = arith.constant 0 : index
    %c0_7 = arith.constant 0 : index
    %11 = vector.load %arg4[%c0_6, %c0_7] : memref<8x128xf32, #tpu.memory_space<vmem>>, vector<8x128xf32>
    %12 = arith.mulf %11, %10 : vector<8x128xf32>
    %13 = arith.addf %6, %12 : vector<8x128xf32>
    %c0_8 = arith.constant 0 : index
    %c0_9 = arith.constant 0 : index
    %14 = vector.load %arg5[%c0_8, %c0_9] : memref<8x128xf32, #tpu.memory_space<vmem>>, vector<8x128xf32>
    tpu.vector_store %arg5[%c0_8, %c0_9], %13 {strides = array<i32>} : memref<8x128xf32, #tpu.memory_space<vmem>>, vector<8x128xf32>,
    %c0_10 = arith.constant 0 : index
    %c0_11 = arith.constant 0 : index
    %15 = vector.load %arg6[%c0_10, %c0_11] : memref<8x128xf32, #tpu.memory_space<vmem>>, vector<8x128xf32>
    tpu.vector_store %arg6[%c0_10, %c0_11], %6 {strides = array<i32>} : memref<8x128xf32, #tpu.memory_space<vmem>>, vector<8x128xf32>,
    %c0_12 = arith.constant 0 : index
    %c0_13 = arith.constant 0 : index
    %16 = vector.load %arg7[%c0_12, %c0_13] : memref<8x128xf32, #tpu.memory_space<vmem>>, vector<8x128xf32>
    tpu.vector_store %arg7[%c0_12, %c0_13], %7 {strides = array<i32>} : memref<8x128xf32, #tpu.memory_space<vmem>>, vector<8x128xf32>,
    return
  }
  func.func @transform_0(%arg0: i32) -> (i32, i32) {
    %c0_i32 = arith.constant 0 : i32
    %c0_i32_0 = arith.constant 0 : i32
    return %arg0, %c0_i32 : i32, i32
  }
  func.func @transform_1(%arg0: i32) -> (i32, i32) {
    %c0_i32 = arith.constant 0 : i32
    %c0_i32_0 = arith.constant 0 : i32
    %c0_i32_1 = arith.constant 0 : i32
    return %c0_i32, %c0_i32_0 : i32, i32
  }
  func.func @transform_2(%arg0: i32) -> (i32, i32) {
    %c0_i32 = arith.constant 0 : i32
    %c0_i32_0 = arith.constant 0 : i32
    %c0_i32_1 = arith.constant 0 : i32
    return %c0_i32, %c0_i32_0 : i32, i32
  }
  func.func @transform_3(%arg0: i32) -> (i32, i32) {
    %c0_i32 = arith.constant 0 : i32
    %c0_i32_0 = arith.constant 0 : i32
    return %arg0, %c0_i32 : i32, i32
  }
  func.func @transform_4(%arg0: i32) -> (i32, i32) {
    %c0_i32 = arith.constant 0 : i32
    %c0_i32_0 = arith.constant 0 : i32
    return %arg0, %c0_i32 : i32, i32
  }
  func.func @transform_5(%arg0: i32) -> (i32, i32) {
    %c0_i32 = arith.constant 0 : i32
    %c0_i32_0 = arith.constant 0 : i32
    return %arg0, %c0_i32 : i32, i32
  }
  func.func @transform_6(%arg0: i32) -> (i32, i32) {
    %c0_i32 = arith.constant 0 : i32
    %c0_i32_0 = arith.constant 0 : i32
    return %arg0, %c0_i32 : i32, i32
  }
}

</mosaic_0001>

<bundles_post_ra>
// kernel: latent_encoder_forward.1
= control target key start
LH: loop header
LB: loop body
LE: loop exit
PB: predicated region body
PF: predicated region fallthrough
CT: control target
= control target key end

     0   :  { %12 = vsyncpa [#allocation3], 0  ;;  %s401_s0 = inlined_call_operand.vmem [shape: f32[8,32], index: 0, kind: input, shape index: {}]   ;;  %s402_s1 = inlined_call_operand.hbm [shape: f32[32,256], index: 1, kind: input, shape index: {}]   ;;  %s403_s2 = inlined_call_operand.vmem [shape: f32[1,256], index: 2, kind: input, shape index: {}]   ;;  %s404_s3 = inlined_call_operand.vmem [shape: f32[8,128], index: 3, kind: input, shape index: {}]   ;;  %s405_s4 = inlined_call_operand.hbm [shape: f32[8,128], index: 4, kind: output, shape index: {0}]   ;;  %s406_s5 = inlined_call_operand.hbm [shape: f32[8,128], index: 5, kind: output, shape index: {1}]   ;;  %s407_s6 = inlined_call_operand.hbm [shape: f32[8,128], index: 6, kind: output, shape index: {2}]  }
   0x1   :  { %13 = vsyncpa [#allocation4], 0 }
   0x2   :  { %14 = vsyncpa [#allocation7], 0  ;;  %s295_s21 = smov [#allocation2]   ;;  %s201_s25 = scalar_lea.hbm %s402_s1, 1024 }
   0x3   :  { %s22_s22 = sshll.u32 %s295_s21, 4  ;;  %p202_p0 = scmp.ne.s32.totalorder %s402_s1, %s201_s25  ;;  %s23_s22 = int_to_ptr.vmem [resolvable:$true] %s22_s22 }
   0x4   :  { %p205_p1 = scmp.lt.u32.totalorder %s201_s25, %s402_s1 }
   0x6   :  { %p207_p2 = pnand %p205_p1, %p202_p0 }
   0x8   :  { %210 = shalt.err (!%p207_p2)
}
   0x9   :  { %s211_s30 = scalar_lea.vmem %s23_s22, 1024  ;;  %p216_p4 = scmp.lt.s32.totalorder %s23_s22, %s23_s22 }
   0xa   :  { %p212_p3 = scmp.ne.s32.totalorder %s23_s22, %s211_s30  ;;  %p217_p5 = scmp.lt.s32.totalorder %s211_s30, %s211_s30 }
   0xc   :  { %p218_p6 = por %p217_p5, %p216_p4 }
   0xe   :  { %p219_p7 = pnand %p218_p6, %p212_p3 }
  0x10   :  { %222 = shalt.err (!%p219_p7)
}
  0x11   :  { %s296_s7 = smov 256   ;;  %s297_s8 = smov 16  }
  0x12   :  { %28 = dma.hbm_to_vmem [thread:$0]  %s402_s1, 1024, %s23_s22, [#allocation3], %s296_s7, %s296_s7, %s297_s8  }
  0x13   :  { %289 = dma.done.wait [#allocation3], 1024  }
  0x14   :  { %290 = vsyncadd [#allocation3], 4294966272  ;;  %v298_v0 = vmov 0.0   ;;  %v38_v1 = vld [vmem:[#allocation2 + $0x8] sm:$0xff]  ;;  %v40_v2 = vld [vmem:[#allocation2 + $0x18] sm:$0xff]  ;;  %vm57_vm0 = vcmask 261120   ;;  %v47_v14 = vlaneseq }
  0x15   :  { %125 = vmatprep.mubr.f32.mxu0 %v298_v0  ;;  %v37_v3 = vld [vmem:[#allocation2] sm:$0xff]  ;;  %v184_v4 = vpack.c.bf16 %v40_v2, %v38_v1  ;;  %v39_v5 = vld [vmem:[#allocation2 + $0x10] sm:$0xff]  ;;  %v42_v6 = vld [vmem:[#allocation2 + $0x28] sm:$0xff]  ;;  %s299_s14 = smov [#allocation6]   ;;  %s300_s16 = smov [#allocation8]  }
  0x16   :  { %v44_v7 = vld [vmem:[#allocation2 + $0x38] sm:$0xff]  ;;  %v186_v8 = vpack.c.bf16 %v39_v5, %v37_v3  ;;  %v41_v10 = vld [vmem:[#allocation2 + $0x20] sm:$0xff]  ;;  %v43_v11 = vld [vmem:[#allocation2 + $0x30] sm:$0xff]  ;;  %v48_v15 = vshrl.u32 %v47_v14, 7  ;;  %s157_s15 = sshll.u32 %s299_s14, 4  ;;  %s167_s17 = sshll.u32 %s300_s16, 4  ;;  %s158_s15 = int_to_ptr.vmem [resolvable:$true] %s157_s15  ;;  %s355_s17 = int_to_ptr.vmem [resolvable:$true] %s167_s17 }
  0x17   :  { %v188_v9 = vpack.c.bf16 %v44_v7, %v42_v6  ;;  %185 = vmatprep.subr.bf16.mxu0 %v184_v4  ;;  %v190_v12 = vpack.c.bf16 %v43_v11, %v41_v10  ;;  %v36_v13 = vld [vmem:[%s401_s0] sm:$0xff]  ;;  %s223_s0 = scalar_lea.vmem %s158_s15, 128  ;;  %p228_p9 = scmp.lt.s32.totalorder %s158_s15, %s158_s15 }
  0x18   :  { %187 = vmatpush1.bf16.msra.mxu0 %v186_v8  ;;  %v49_v16 = vsub.s32 0, %v48_v15  ;;  %v45_v17 = vld [vmem:[%s403_s2] sm:$0x3]  ;;  %v53_v18 = vsub.s32 1, %v48_v15  ;;  %p224_p8 = scmp.ne.s32.totalorder %s158_s15, %s223_s0  ;;  %p229_p10 = scmp.lt.s32.totalorder %s223_s0, %s223_s0 }
  0x19   :  { %189 = vmatprep.subr.bf16.mxu0 %v188_v9 }
  0x1a   :  { %v50_v19 = vrot.slane %v45_v17, %v49_v16  ;;  %v54_v20 = vrot.slane %v45_v17, %v53_v18  ;;  %p230_p11 = por %p229_p10, %p228_p9 }
  0x1c   :  { %191 = vmatpush1.bf16.msra.mxu0 %v190_v12  ;;  %p231_p12 = pnand %p230_p11, %p224_p8 }
  0x1f   :  { %183 = vmatmul.mubr.msk.f32.vlgmr.msra.gmra.mrb[0].mxu0 %vm57_vm0, %v36_v13 }
  0xf2   :  { %v127_v21 = vpop.f32.mrb[0].mxu0 }
  0xf3   :  { %v128_v22 = vadd.f32 %v127_v21, %v50_v19  ;;  %v129_v23 = vpop.f32.mrb[1].mxu0 }
  0xf4   :  { %v130_v24 = vadd.f32 %v129_v23, %v54_v20 }
  0xf5   :  { %139 = vst [vmem:[#allocation6] sm:$0xff] %v128_v22 }
  0xf6   :  { %v132_v25 = vmul.f32 0.5, %v130_v24  ;;  %140 = vst [vmem:[#allocation8] sm:$0xff] %v130_v24 }
  0xf7   :  { %234 = shalt.err (!%p231_p12)
}
  0xf8   :  { %s235_s19 = scalar_lea.hbm %s406_s5, 128 }
  0xf9   :  { %p236_p13 = scmp.ne.s32.totalorder %s406_s5, %s235_s19  ;;  %p239_p0 = scmp.lt.u32.totalorder %s235_s19, %s406_s5 }
  0xfb   :  { %p241_p1 = pnand %p239_p0, %p236_p13 }
  0xfd   :  { %244 = shalt.err (!%p241_p1)
}
  0xfe   :  { %160 = dma.vmem_to_hbm [thread:$0]  %s158_s15, 128, %s406_s5, [#allocation7]  }
  0xff   :  { %s245_s26 = scalar_lea.vmem %s355_s17, 128  ;;  %p250_p3 = scmp.lt.s32.totalorder %s355_s17, %s355_s17 }
 0x100   :  { %p246_p2 = scmp.ne.s32.totalorder %s355_s17, %s245_s26  ;;  %p251_p4 = scmp.lt.s32.totalorder %s245_s26, %s245_s26 }
 0x102   :  { %p252_p5 = por %p251_p4, %p250_p3 }
 0x104   :  { %p253_p6 = pnand %p252_p5, %p246_p2 }
 0x106   :  { %256 = shalt.err (!%p253_p6)
}
 0x107   :  { %s257_s29 = scalar_lea.hbm %s407_s6, 128 }
 0x108   :  { %p258_p7 = scmp.ne.s32.totalorder %s407_s6, %s257_s29  ;;  %p261_p8 = scmp.lt.u32.totalorder %s257_s29, %s407_s6 }
 0x10a   :  { %p263_p9 = pnand %p261_p8, %p258_p7 }
 0x10c   :  { %266 = shalt.err (!%p263_p9)
}
 0x10d   :  { %170 = dma.vmem_to_hbm [thread:$0]  %s355_s17, 128, %s407_s6, [#allocation7]   ;;  %v133_v26 = vmul.f32 1.442695, %v132_v25  ;;  %v135_v27 = vld [vmem:[%s404_s3] sm:$0xff] }
 0x10e   :  { %s301_s12 = smov [#allocation5]  }
 0x10f   :  { %199 = vpow2.f32 %v133_v26  ;;  %s147_s13 = sshll.u32 %s301_s12, 4  ;;  %s148_s13 = int_to_ptr.vmem [resolvable:$true] %s147_s13 }
 0x110   :  { %s267_s14 = scalar_lea.vmem %s148_s13, 128  ;;  %p272_p11 = scmp.lt.s32.totalorder %s148_s13, %s148_s13 }
 0x111   :  { %p268_p10 = scmp.ne.s32.totalorder %s148_s13, %s267_s14  ;;  %p273_p12 = scmp.lt.s32.totalorder %s267_s14, %s267_s14 }
 0x113   :  { %p274_p13 = por %p273_p12, %p272_p11 }
 0x115   :  { %p275_p0 = pnand %p274_p13, %p268_p10 }
 0x119   :  { %v200_v28 = vpop.eup %199 }
 0x11a   :  { %v136_v29 = vmul.f32 %v200_v28, %v135_v27 }
 0x11c   :  { %v137_v30 = vadd.f32 %v136_v29, %v128_v22 }
 0x11e   :  { %138 = vst [vmem:[#allocation5] sm:$0xff] %v137_v30 }
 0x11f   :  { %278 = shalt.err (!%p275_p0)
}
 0x120   :  { %s279_s16 = scalar_lea.hbm %s405_s4, 128 }
 0x121   :  { %p280_p1 = scmp.ne.s32.totalorder %s405_s4, %s279_s16  ;;  %p283_p2 = scmp.lt.u32.totalorder %s279_s16, %s405_s4 }
 0x123   :  { %p285_p3 = pnand %p283_p2, %p280_p1 }
 0x125   :  { %288 = shalt.err (!%p285_p3)
}
 0x126   :  { %150 = dma.vmem_to_hbm [thread:$0]  %s148_s13, 128, %s405_s4, [#allocation4]  }
 0x127   :  { %291 = dma.done.wait [#allocation4], 128  }
 0x128   :  { %292 = vsyncadd [#allocation4], 4294967168 }
 0x129   :  { %293 = dma.done.wait [#allocation7], 256  }
 0x12a   :  { %294 = vsyncadd [#allocation7], 4294967040 }
 0x12b   :  { %180 = vsyncpa [#allocation3], 1 }
 0x12c   :  { %181 = vsyncpa [#allocation4], 1 }
 0x12d   :  { %182 = vsyncpa [#allocation7], 1 }

</bundles_post_ra>
